<compile_context>
chip_gen: v7x
topology: tpu7x:2x2x1
jax: 0.10.0
libtpu: 0.0.40
codegen_flags: <defaults>
</compile_context>

<pallas_src>
import jax
import jax.numpy as jnp
from jax import lax
from jax.experimental import pallas as pl
from jax.experimental.pallas import tpu as pltpu

_LANES = 128
_SUBLANES = 8


def _laplacian_loss_kernel(n_ref, mu_ref, si_ref, xx_ref, out_ref, acc_ref):
    """Dense (rows, 128) Laplacian-NLL partial sums; one cross-lane reduce at end."""
    i = pl.program_id(0)
    tile_rows = mu_ref.shape[0]

    @pl.when(i == 0)
    def _init():
        acc_ref[...] = jnp.zeros_like(acc_ref)

    mu = mu_ref[...]                                   # (tile_rows, 128)
    si = si_ref[...]
    xx = xx_ref[...]

    inv_xx = pl.reciprocal(xx, approx=False)           # exact: keeps 1e-5 tolerance
    values = jnp.abs(1.0 - mu * inv_xx) * jnp.exp(-si) + si

    # Mask off elements past the true batch size (ragged tail of last tile).
    row = lax.broadcasted_iota(jnp.int32, values.shape, 0)
    lane = lax.broadcasted_iota(jnp.int32, values.shape, 1)
    gidx = (i * tile_rows + row) * _LANES + lane
    n = n_ref[0]                                        # runtime batch size (SMEM)
    acc_ref[...] += jnp.where(gidx < n, values, 0.0)    # VPU-only accumulation

    @pl.when(i == pl.num_programs(0) - 1)
    def _finalize():
        out_ref[0, 0] = jnp.sum(acc_ref[...]) / n.astype(jnp.float32)


def laplacian_loss(outputs, targets, *, max_block_rows=1024):
    """outputs: (N, 2) f32; targets: (N, 1) or (N,) f32 -> scalar f32 mean loss."""
    n, two = outputs.shape
    assert two == 2 and n > 0

    mu = outputs[:, 0].astype(jnp.float32)
    si = outputs[:, 1].astype(jnp.float32)
    xx = targets.astype(jnp.float32).reshape(n)

    # Bucket the padded length to the next power of two (>= 8*128) -> compile-once
    # behavior across varying detection counts; pad values are don't-cares (masked
    # in-kernel), xx padded with 1.0 just to avoid inf lanes.
    min_bucket = _LANES * _SUBLANES
    bucket = max(min_bucket, 1 << (n - 1).bit_length())
    pad = bucket - n
    if pad:
        mu = jnp.pad(mu, (0, pad))
        si = jnp.pad(si, (0, pad))
        xx = jnp.pad(xx, (0, pad), constant_values=1.0)

    rows = bucket // _LANES                             # power of two, >= 8
    mu2 = mu.reshape(rows, _LANES)
    si2 = si.reshape(rows, _LANES)
    xx2 = xx.reshape(rows, _LANES)

    tile_rows = min(int(max_block_rows), rows)
    assert tile_rows % _SUBLANES == 0 and rows % tile_rows == 0, (rows, tile_rows)
    grid = (rows // tile_rows,)

    n_arr = jnp.array([n], dtype=jnp.int32)

    block = lambda i, n_ref: (i, 0)
    out = pl.pallas_call(
        _laplacian_loss_kernel,
        out_shape=jax.ShapeDtypeStruct((1, 1), jnp.float32),
        grid_spec=pltpu.PrefetchScalarGridSpec(
            num_scalar_prefetch=1,
            grid=grid,
            in_specs=[
                pl.BlockSpec((tile_rows, _LANES), block),
                pl.BlockSpec((tile_rows, _LANES), block),
                pl.BlockSpec((tile_rows, _LANES), block),
            ],
            out_specs=pl.BlockSpec((1, 1), lambda i, n_ref: (0, 0),
                                   memory_space=pltpu.SMEM),
            scratch_shapes=[pltpu.VMEM((tile_rows, _LANES), jnp.float32)],
        ),
        compiler_params=pltpu.CompilerParams(
            # Running-sum accumulator across the grid -> sequential axis.
            dimension_semantics=("arbitrary",)
        ),
    )(n_arr, mu2, si2, xx2)
    return out[0, 0]


def _reference(outputs, targets):
    mu, si = outputs[:, 0:1], outputs[:, 1:2]
    norm = 1.0 - mu / targets
    values = jnp.abs(norm) * jnp.exp(-si) + si
    return jnp.mean(values)


if __name__ == "__main__":
    key = jax.random.PRNGKey(0)
    k_mu, k_si, k_xx = jax.random.split(key, 3)

    # Typical batch of detections (not a multiple of 128 -> exercises masking).
    N = 200
    mu = jax.random.uniform(k_mu, (N, 1), jnp.float32, 1.0, 20.0)
    si = jax.random.uniform(k_si, (N, 1), jnp.float32, -1.0, 1.0)
    outputs = jnp.concatenate([mu, si], axis=1)                          # (N, 2)
    targets = jax.random.uniform(k_xx, (N, 1), jnp.float32, 2.0, 25.0)   # (N, 1)

    ref = _reference(outputs, targets)
    loss = laplacian_loss(outputs, targets)
    jax.block_until_ready(loss)
    assert jnp.allclose(loss, ref, rtol=1e-5, atol=1e-5), (loss, ref)

    # Multi-grid-step path: several tiles, running-sum accumulation, and the
    # in-kernel tail mask spanning more than one tile.
    N2 = 2500
    k2_mu, k2_si, k2_xx = jax.random.split(jax.random.PRNGKey(1), 3)
    mu2 = jax.random.uniform(k2_mu, (N2, 1), jnp.float32, 1.0, 20.0)
    si2 = jax.random.uniform(k2_si, (N2, 1), jnp.float32, -1.0, 1.0)
    outputs2 = jnp.concatenate([mu2, si2], axis=1)
    targets2 = jax.random.uniform(k2_xx, (N2, 1), jnp.float32, 2.0, 25.0)

    ref2 = _reference(outputs2, targets2)
    loss2 = laplacian_loss(outputs2, targets2, max_block_rows=8)
    jax.block_until_ready(loss2)
    assert jnp.allclose(loss2, ref2, rtol=1e-5, atol=1e-5), (loss2, ref2)

    print("KERNEL_OK")
</pallas_src>

<mosaic_0001>
module attributes {stable_mosaic.version = 11 : i64} {
  func.func @_laplacian_loss_kernel(%arg0: i32, %arg1: memref<1xi32, #tpu.memory_space<smem>>, %arg2: memref<8x128xf32, #tpu.memory_space<vmem>>, %arg3: memref<8x128xf32, #tpu.memory_space<vmem>>, %arg4: memref<8x128xf32, #tpu.memory_space<vmem>>, %arg5: memref<1x1xf32, #tpu.memory_space<smem>>, %arg6: memref<8x128xf32, #tpu.memory_space<vmem>>) attributes {dimension_semantics = [#tpu.dimension_semantics<arbitrary>], iteration_bounds = array<i64: 1>, scalar_prefetch = 1 : i64, scratch_operands = 1 : i64, tpu.core_type = #tpu.core_type<tc>, window_params = [{transform_indices = @transform_0, window_bounds = array<i64: 8, 128>}, {transform_indices = @transform_1, window_bounds = array<i64: 8, 128>}, {transform_indices = @transform_2, window_bounds = array<i64: 8, 128>}, {transform_indices = @transform_3, window_bounds = array<i64: 1, 1>}]} {
    %c0_i32 = arith.constant 0 : i32
    %0 = arith.cmpi eq, %arg0, %c0_i32 : i32
    %1 = arith.extui %0 : i1 to i32
    %c0_i32_0 = arith.constant 0 : i32
    %2 = arith.cmpi ne, %1, %c0_i32_0 : i32
    scf.if %2 {
      %cst_15 = arith.constant 0.000000e+00 : f32
      %35 = vector.broadcast %cst_15 : f32 to vector<8x128xf32>
      %c0_16 = arith.constant 0 : index
      %c0_17 = arith.constant 0 : index
      %36 = vector.load %arg6[%c0_16, %c0_17] : memref<8x128xf32, #tpu.memory_space<vmem>>, vector<8x128xf32>
      tpu.vector_store %arg6[%c0_16, %c0_17], %35 {strides = array<i32>} : memref<8x128xf32, #tpu.memory_space<vmem>>, vector<8x128xf32>,
    } else {
    }
    %c0 = arith.constant 0 : index
    %c0_1 = arith.constant 0 : index
    %3 = vector.load %arg2[%c0, %c0_1] : memref<8x128xf32, #tpu.memory_space<vmem>>, vector<8x128xf32>
    %c0_2 = arith.constant 0 : index
    %c0_3 = arith.constant 0 : index
    %4 = vector.load %arg3[%c0_2, %c0_3] : memref<8x128xf32, #tpu.memory_space<vmem>>, vector<8x128xf32>
    %c0_4 = arith.constant 0 : index
    %c0_5 = arith.constant 0 : index
    %5 = vector.load %arg4[%c0_4, %c0_5] : memref<8x128xf32, #tpu.memory_space<vmem>>, vector<8x128xf32>
    %6 = tpu.reciprocal %5 : vector<8x128xf32> -> vector<8x128xf32>
    %7 = arith.mulf %3, %6 : vector<8x128xf32>
    %cst = arith.constant 1.000000e+00 : f32
    %8 = vector.broadcast %cst : f32 to vector<8x128xf32>
    %9 = arith.subf %8, %7 : vector<8x128xf32>
    %10 = math.absf %9 : vector<8x128xf32>
    %cst_6 = arith.constant 0.000000e+00 : f32
    %11 = vector.broadcast %cst_6 : f32 to vector<8x128xf32>
    %12 = arith.subf %11, %4 : vector<8x128xf32>
    %13 = math.exp %12 : vector<8x128xf32>
    %14 = arith.mulf %10, %13 : vector<8x128xf32>
    %15 = arith.addf %14, %4 : vector<8x128xf32>
    %16 = tpu.iota {dimensions = array<i32: 0>} : vector<8x128xi32>
    %17 = tpu.iota {dimensions = array<i32: 1>} : vector<8x128xi32>
    %c8_i32 = arith.constant 8 : i32
    %18 = arith.muli %arg0, %c8_i32 : i32
    %19 = vector.broadcast %18 : i32 to vector<8x128xi32>
    %20 = arith.addi %19, %16 : vector<8x128xi32>
    %c128_i32 = arith.constant 128 : i32
    %21 = vector.broadcast %c128_i32 : i32 to vector<8x128xi32>
    %22 = arith.muli %20, %21 : vector<8x128xi32>
    %23 = arith.addi %22, %17 : vector<8x128xi32>
    %c0_7 = arith.constant 0 : index
    %24 = memref.load %arg1[%c0_7] : memref<1xi32, #tpu.memory_space<smem>>
    %c0_8 = arith.constant 0 : index
    %c0_9 = arith.constant 0 : index
    %25 = vector.load %arg6[%c0_8, %c0_9] : memref<8x128xf32, #tpu.memory_space<vmem>>, vector<8x128xf32>
    %26 = vector.broadcast %24 : i32 to vector<8x128xi32>
    %27 = arith.cmpi slt, %23, %26 : vector<8x128xi32>
    %cst_10 = arith.constant 0.000000e+00 : f32
    %28 = vector.broadcast %cst_10 : f32 to vector<8x128xf32>
    %29 = arith.select %27, %15, %28 : vector<8x128xi1>, vector<8x128xf32>
    %30 = arith.addf %25, %29 : vector<8x128xf32>
    %c0_11 = arith.constant 0 : index
    %c0_12 = arith.constant 0 : index
    %31 = vector.load %arg6[%c0_11, %c0_12] : memref<8x128xf32, #tpu.memory_space<vmem>>, vector<8x128xf32>
    tpu.vector_store %arg6[%c0_11, %c0_12], %30 {strides = array<i32>} : memref<8x128xf32, #tpu.memory_space<vmem>>, vector<8x128xf32>,
    %c0_i32_13 = arith.constant 0 : i32
    %32 = arith.cmpi eq, %arg0, %c0_i32_13 : i32
    %33 = arith.extui %32 : i1 to i32
    %c0_i32_14 = arith.constant 0 : i32
    %34 = arith.cmpi ne, %33, %c0_i32_14 : i32
    scf.if %34 {
      %c0_15 = arith.constant 0 : index
      %c0_16 = arith.constant 0 : index
      %35 = vector.load %arg6[%c0_15, %c0_16] : memref<8x128xf32, #tpu.memory_space<vmem>>, vector<8x128xf32>
      %36 = vector.shape_cast %35 : vector<8x128xf32> to vector<1x8x128xf32>
      %cst_17 = arith.constant dense<0.000000e+00> : vector<1xf32>
      %37 = vector.multi_reduction <add>, %36, %cst_17 [1, 2] : vector<1x8x128xf32> to vector<1xf32>
      %38 = vector.shape_cast %37 : vector<1xf32> to vector<1x1x1xf32>
      %39 = vector.extract %38[0, 0, 0] : f32 from vector<1x1x1xf32>
      %40 = arith.sitofp %24 : i32 to f32
      %41 = arith.divf %39, %40 : f32
      %c0_18 = arith.constant 0 : index
      %c0_19 = arith.constant 0 : index
      %42 = memref.load %arg5[%c0_18, %c0_19] : memref<1x1xf32, #tpu.memory_space<smem>>
      memref.store %41, %arg5[%c0_18, %c0_19] : memref<1x1xf32, #tpu.memory_space<smem>>
    } else {
    }
    return
  }
  func.func @transform_0(%arg0: i32, %arg1: memref<1xi32, #tpu.memory_space<smem>>) -> (i32, i32) {
    %c0_i32 = arith.constant 0 : i32
    %c0_i32_0 = arith.constant 0 : i32
    return %arg0, %c0_i32 : i32, i32
  }
  func.func @transform_1(%arg0: i32, %arg1: memref<1xi32, #tpu.memory_space<smem>>) -> (i32, i32) {
    %c0_i32 = arith.constant 0 : i32
    %c0_i32_0 = arith.constant 0 : i32
    return %arg0, %c0_i32 : i32, i32
  }
  func.func @transform_2(%arg0: i32, %arg1: memref<1xi32, #tpu.memory_space<smem>>) -> (i32, i32) {
    %c0_i32 = arith.constant 0 : i32
    %c0_i32_0 = arith.constant 0 : i32
    return %arg0, %c0_i32 : i32, i32
  }
  func.func @transform_3(%arg0: i32, %arg1: memref<1xi32, #tpu.memory_space<smem>>) -> (i32, i32) {
    %c0_i32 = arith.constant 0 : i32
    %c0_i32_0 = arith.constant 0 : i32
    %c0_i32_1 = arith.constant 0 : i32
    return %c0_i32, %c0_i32_0 : i32, i32
  }
}

</mosaic_0001>

<bundles_post_ra>
// kernel: tpu_custom_call.1
= control target key start
LH: loop header
LB: loop body
LE: loop exit
PB: predicated region body
PF: predicated region fallthrough
CT: control target
= control target key end

     0   :  { %10 = vsyncpa [#allocation6], 0  ;;  %s255_s0 = inlined_call_operand.<no memory space> [shape: s32[1], index: 0, kind: input, shape index: {}]   ;;  %s256_s1 = inlined_call_operand.hbm [shape: f32[8,128], index: 1, kind: input, shape index: {}]   ;;  %s257_s2 = inlined_call_operand.hbm [shape: f32[8,128], index: 2, kind: input, shape index: {}]   ;;  %s258_s3 = inlined_call_operand.vmem [shape: f32[8,128], index: 3, kind: input, shape index: {}]   ;;  %s259_s4 = inlined_call_operand.hbm [shape: f32[1,1], index: 4, kind: output, shape index: {}]  }
   0x1   :  { %11 = vsyncpa [#allocation9], 0 }
   0x2   :  { %12 = vsyncpa [#allocation7], 0  ;;  %s182_s15 = smov [#allocation5]   ;;  %s183_s17 = smov [#allocation8]  }
   0x3   :  { %s19_s16 = sshll.u32 %s182_s15, 4  ;;  %s29_s18 = sshll.u32 %s183_s17, 4  ;;  %s20_s16 = int_to_ptr.vmem [resolvable:$true] %s19_s16  ;;  %s30_s18 = int_to_ptr.vmem [resolvable:$true] %s29_s18 }
   0x4   :  { %s122_s21 = scalar_lea.hbm %s256_s1, 128 }
   0x5   :  { %p123_p0 = scmp.ne.s32.totalorder %s256_s1, %s122_s21  ;;  %p126_p1 = scmp.lt.u32.totalorder %s122_s21, %s256_s1 }
   0x7   :  { %p128_p2 = pnand %p126_p1, %p123_p0 }
   0x9   :  { %131 = shalt.err (!%p128_p2)
}
   0xa   :  { %s132_s26 = scalar_lea.vmem %s20_s16, 128  ;;  %p137_p4 = scmp.lt.s32.totalorder %s20_s16, %s20_s16 }
   0xb   :  { %p133_p3 = scmp.ne.s32.totalorder %s20_s16, %s132_s26  ;;  %p138_p5 = scmp.lt.s32.totalorder %s132_s26, %s132_s26 }
   0xd   :  { %p139_p6 = por %p138_p5, %p137_p4 }
   0xf   :  { %p140_p7 = pnand %p139_p6, %p133_p3 }
  0x11   :  { %143 = shalt.err (!%p140_p7)
}
  0x12   :  { %22 = dma.hbm_to_vmem [thread:$0]  %s256_s1, 128, %s20_s16, [#allocation6]  }
  0x13   :  { %s144_s5 = scalar_lea.hbm %s257_s2, 128 }
  0x14   :  { %p145_p8 = scmp.ne.s32.totalorder %s257_s2, %s144_s5  ;;  %p148_p9 = scmp.lt.u32.totalorder %s144_s5, %s257_s2 }
  0x16   :  { %p150_p10 = pnand %p148_p9, %p145_p8 }
  0x18   :  { %153 = shalt.err (!%p150_p10)
}
  0x19   :  { %s154_s10 = scalar_lea.vmem %s30_s18, 128  ;;  %p159_p12 = scmp.lt.s32.totalorder %s30_s18, %s30_s18 }
  0x1a   :  { %p155_p11 = scmp.ne.s32.totalorder %s30_s18, %s154_s10  ;;  %p160_p13 = scmp.lt.s32.totalorder %s154_s10, %s154_s10 }
  0x1c   :  { %p161_p0 = por %p160_p13, %p159_p12 }
  0x1e   :  { %p162_p1 = pnand %p161_p0, %p155_p11 }
  0x20   :  { %165 = shalt.err (!%p162_p1)
}
  0x21   :  { %32 = dma.hbm_to_vmem [thread:$0]  %s257_s2, 128, %s30_s18, [#allocation9]  }
  0x22   :  { %176 = dma.done.wait [#allocation6], 128  }
  0x23   :  { %177 = vsyncadd [#allocation6], 4294967168 }
  0x24   :  { %178 = dma.done.wait [#allocation9], 128  }
  0x25   :  { %179 = vsyncadd [#allocation9], 4294967168  ;;  %v47_v0 = vld [vmem:[#allocation8] sm:$0xff]  ;;  %v48_v1 = vld [vmem:[%s258_s3] sm:$0xff]  ;;  %v58_v4 = vlaneseq  ;;  %v69_v15 = vstv %s255_s0  ;;  %s87_s16 = scvt.s32.f32 %s255_s0  ;;  %s166_s0 = scalar_lea.hbm %s259_s4, 16 }
  0x26   :  { %116 = vrcp.f32 %v48_v1  ;;  %v53_v2 = vsub.f32 0.0, %v47_v0  ;;  %v46_v6 = vld [vmem:[#allocation5] sm:$0xff]  ;;  %p167_p2 = scmp.ne.s32.totalorder %s259_s4, %s166_s0  ;;  %p170_p3 = scmp.lt.u32.totalorder %s166_s0, %s259_s4 }
  0x27   :  { %v59_v5 = vshrl.u32 %v58_v4, 7  ;;  %v61_v8 = vand.u32 127, %v58_v4  ;;  %v88_v19 = vstv %s87_s16 }
  0x28   :  { %v54_v3 = vmul.f32 1.442695, %v53_v2  ;;  %p172_p4 = pnand %p170_p3, %p167_p2 }
  0x29   :  { %v65_v9 = vmul.u32 128, %v59_v5 }
  0x2a   :  { %118 = vpow2.f32 %v54_v3 }
  0x2b   :  { %v66_v13 = vadd.s32 %v65_v9, %v61_v8  ;;  %120 = vrcp.f32 %v88_v19 }
  0x2d   :  { %vm70_vm0 = vcmp.lt.s32.totalorder %v66_v13, %v69_v15 }
  0x30   :  { %v117_v7 = vpop.eup %116 }
  0x31   :  { %v50_v10 = vmul.f32 %v117_v7, %v46_v6 }
  0x33   :  { %v51_v11 = vsub.f32 1.0, %v50_v10 }
  0x34   :  { %v119_v12 = vpop.eup %118 }
  0x35   :  { %v52_v14 = vand.u32 2147483647, %v51_v11  ;;  %v121_v26 = vpop.eup %120 }
  0x37   :  { %v56_v16 = vmul.f32 %v119_v12, %v52_v14 }
  0x39   :  { %v57_v17 = vadd.f32 %v56_v16, %v47_v0 }
  0x3b   :  { %v71_v18 = vsel %vm70_vm0, %v57_v17, 0.0 }
  0x3c   :  { %78 = vadd.xlane.f32.xlu0 %v71_v18 }
  0xc9   :  { %v79_v20 = vpop.xlane.xlu0 %78 }
  0xca   :  { %v80_v21 = vrot.slane %v79_v20, 4 }
  0xcc   :  { %v81_v22 = vadd.f32 %v80_v21, %v79_v20 }
  0xce   :  { %v82_v23 = vrot.slane %v81_v22, 2 }
  0xd0   :  { %v83_v24 = vadd.f32 %v82_v23, %v81_v22 }
  0xd2   :  { %v84_v25 = vrot.slane %v83_v24, 1 }
  0xd4   :  { %v85_v27 = vadd.f32 %v84_v25, %v83_v24 }
  0xd6   :  { %109 = vpush %v85_v27 }
  0xd7   :  { %111 = vpush %v121_v26 }
 0x107   :  { %s110_s17 = spop %109 }
 0x108   :  { %s112_s18 = spop %111 }
 0x109   :  { %s91_s19 = smul.f32 %s112_s18, %s110_s17 }
 0x10b   :  { %93 = sst [smem:[#allocation10]] %s91_s19 }
 0x10c   :  { %175 = shalt.err (!%p172_p4)
}
 0x10d   :  { %s184_s26 = smov [#allocation10]  }
 0x10e   :  { %101 = dma.smem_to_hbm %s184_s26, 16, %s259_s4, [#allocation7]  }
 0x10f   :  { %180 = dma.done.wait [#allocation7], 16  }
 0x110   :  { %181 = vsyncadd [#allocation7], 4294967280 }
 0x111   :  { %105 = sfence }
 0x112   :  { %106 = vsyncpa [#allocation6], 1 }
 0x113   :  { %107 = vsyncpa [#allocation9], 1 }
 0x114   :  { %108 = vsyncpa [#allocation7], 1 }

</bundles_post_ra>
